<compile_context>
chip_gen: v7x
topology: tpu7x:2x2x1
jax: 0.10.0
libtpu: 0.0.40
codegen_flags: <defaults>
</compile_context>

<pallas_src>
import numpy as np
import jax
import jax.numpy as jnp
from jax.experimental import pallas as pl
from jax.experimental.pallas import tpu as pltpu

# ----------------------------- "module init" constants -----------------------------
E_MAT = 1000.0          # material['E']
NU = 0.3                # material['nu']
BC_PENALTY = 1.0e10

_C0 = E_MAT / (1.0 - NU * NU)      # plane-stress factor
_C1 = E_MAT / (1.0 + NU)           # shear factor
# te = 0.5*(exx*sxx + eyy*syy + 2*g*sxy) with g = exx+eyy  ==  QA*(exx^2+eyy^2) + QB*exx*eyy
QA = 0.5 * _C0 + _C1
QB = NU * _C0 + 2.0 * _C1

_G = 1.0 / np.sqrt(3.0)
GAUSS_XI = [-_G, _G, _G, -_G]
GAUSS_ETA = [-_G, -_G, _G, _G]
GAUSS_W = [1.0, 1.0, 1.0, 1.0]

LANES = 128
SUBLANES = 8
R_TILE_MAX = 1024      # 1024 rows x 128 lanes = 128K elements / grid step
NUM_FIELDS = 10
BC_ROWS = 8

# Per-Gauss-point compile-time constants (Gauss weights folded in; dead B-entries eliminated):
#   a = A1*dx21 + A2*dx34 ; b = A1*dy21 + A2*dy34
#   c = B1*dx41 + B2*dx32 ; d = B1*dy41 + B2*dy32
#   b06 += inv*(d*DXI3 - c*DETA3) ; b17 += inv*(a*DETA3 - b*DXI3)
_A1, _A2, _B1, _B2, _DXI3, _DETA3 = [], [], [], [], [], []
for _i in range(4):
    _xi, _eta, _w = GAUSS_XI[_i], GAUSS_ETA[_i], GAUSS_W[_i]
    _A1.append(float(0.25 * (1.0 - _eta)))
    _A2.append(float(0.25 * (1.0 + _eta)))
    _B1.append(float(0.25 * (1.0 - _xi)))
    _B2.append(float(0.25 * (1.0 + _xi)))
    _DXI3.append(float(_w * (-0.25) * (1.0 + _eta)))   # dN_dxi[3],  weight folded in
    _DETA3.append(float(_w * 0.25 * (1.0 - _xi)))      # dN_deta[3], weight folded in


def _shape_function_derivatives(xi, eta):
    dN_dxi = 0.25 * np.array([-(1 - eta), 1 - eta, 1 + eta, -(1 + eta)])
    dN_deta = 0.25 * np.array([-(1 - xi), -(1 + xi), 1 + xi, 1 - xi])
    return dN_dxi, dN_deta


# ----------------------------------- Pallas kernel ----------------------------------
def fem_energy_kernel(elem_ref, bc_ref, out_ref, acc_ref):
    """elem_ref: (10, R_TILE, 128) f32, bc_ref: (8, B_pad) f32,
       out_ref: (1, 8, 128) f32 per-core partial, acc_ref: (8, 128) f32 scratch."""
    core = pl.program_id(0)
    step = pl.program_id(1)
    nsteps = pl.num_programs(1)

    @pl.when(step == 0)
    def _init():
        acc_ref[...] = jnp.zeros_like(acc_ref)

    # Precomputed coordinate differences (Gauss-point invariant), lane+sublane dense planes.
    dx21 = elem_ref[0]; dx34 = elem_ref[1]; dx41 = elem_ref[2]; dx32 = elem_ref[3]
    dy21 = elem_ref[4]; dy34 = elem_ref[5]; dy41 = elem_ref[6]; dy32 = elem_ref[7]
    u3 = elem_ref[8]; v3 = elem_ref[9]

    # Only B[0][6] and B[1][7] survive the reference's __calc_strainform__ / j-loop reassignment.
    b06 = None
    b17 = None
    for i in range(4):
        a = _A1[i] * dx21 + _A2[i] * dx34
        b = _A1[i] * dy21 + _A2[i] * dy34
        c = _B1[i] * dx41 + _B2[i] * dx32
        d = _B1[i] * dy41 + _B2[i] * dy32
        det_j = a * d - b * c
        r = pl.reciprocal(det_j, approx=True)     # EUP slot
        r = r * (2.0 - det_j * r)                 # one Newton step -> ~f32-exact 1/det_j
        t06 = r * (d * _DXI3[i] - c * _DETA3[i])
        t17 = r * (a * _DETA3[i] - b * _DXI3[i])
        b06 = t06 if b06 is None else b06 + t06
        b17 = t17 if b17 is None else b17 + t17

    eps_xx = b06 * u3
    eps_yy = b17 * v3
    te = QA * (eps_xx * eps_xx + eps_yy * eps_yy) + QB * (eps_xx * eps_yy)
    te2 = te * te

    # In-tile sublane reduction: (R,128) -> (R/8, 8, 128) aligns with vreg tiles, sum over
    # axis 0 is a pure VPU add chain; only an (8,128) RMW hits the accumulator scratch.
    rt = te2.shape[0]
    acc_ref[...] += jnp.sum(te2.reshape(rt // SUBLANES, SUBLANES, LANES), axis=0)

    @pl.when(step == nsteps - 1)
    def _finalize():
        bc = bc_ref[...]
        diff = bc[0:1, :] - bc[1:2, :]
        bc_loss = jnp.sum(bc[2:3, :] * diff * diff)
        is_core0 = (core == 0).astype(jnp.float32)   # BC term counted once (core 0 only)
        total = jnp.sum(acc_ref[...]) + is_core0 * BC_PENALTY * bc_loss
        out_ref[...] = jnp.zeros(out_ref.shape, jnp.float32) + total


def fem_forward_pallas(elem_slab, bc_slab, r_tile, tiles_per_core, num_cores):
    nfields, r_total, lanes = elem_slab.shape
    assert lanes == LANES and nfields == NUM_FIELDS
    assert r_total == num_cores * tiles_per_core * r_tile

    if num_cores > 1:
        # Real 2-TensorCore split (v7x). Single-TC chips take the num_cores == 1 path below.
        dim_sems = (pltpu.CORE_PARALLEL, pltpu.ARBITRARY)
    else:
        dim_sems = ("arbitrary", "arbitrary")

    out = pl.pallas_call(
        fem_energy_kernel,
        out_shape=jax.ShapeDtypeStruct((num_cores, SUBLANES, LANES), jnp.float32),
        grid_spec=pltpu.PrefetchScalarGridSpec(
            num_scalar_prefetch=0,
            grid=(num_cores, tiles_per_core),
            in_specs=[
                pl.BlockSpec((NUM_FIELDS, r_tile, LANES),
                             lambda c, t: (0, c * tiles_per_core + t, 0)),
                pl.BlockSpec(bc_slab.shape, lambda c, t: (0, 0)),   # tiny, resident
            ],
            out_specs=pl.BlockSpec((1, SUBLANES, LANES), lambda c, t: (c, 0, 0)),
            scratch_shapes=[pltpu.VMEM((SUBLANES, LANES), jnp.float32)],
        ),
        compiler_params=pltpu.CompilerParams(
            dimension_semantics=dim_sems,
            vmem_limit_bytes=32 * 1024 * 1024,
        ),
    )(elem_slab, bc_slab)
    # Sum the per-core partials -> shape (1,) to match the torch scalar output.
    return jnp.sum(out[:, 0, 0:1], axis=0)


# ----------------------------------- JAX glue ----------------------------------------
def _cdiv(a, b):
    return -(-a // b)


def _round_up(a, b):
    return _cdiv(a, b) * b


def _detect_num_tensorcores():
    """Best-effort TensorCore count per chip; defaults to 1 (correct for v5e/v6e)."""
    try:
        info = pltpu.get_tpu_info()
        for attr in ("num_cores", "core_count", "num_tensorcores",
                     "tensorcore_count", "cores_per_chip", "num_cores_per_chip"):
            v = getattr(info, attr, None)
            if isinstance(v, int) and v in (1, 2):
                return v
    except Exception:
        pass
    return 1


def plan_tiling(num_elements, num_cores):
    r_needed = max(1, _cdiv(num_elements, LANES))
    r_per_core = _round_up(_cdiv(r_needed, num_cores), SUBLANES)
    r_tile = min(R_TILE_MAX, r_per_core)
    tiles_per_core = _cdiv(r_per_core, r_tile)
    r_total = num_cores * tiles_per_core * r_tile
    return r_tile, tiles_per_core, r_total


def build_element_slab(nodes, elements, disp, r_total):
    """nodes: (N,2) f32, elements: (E,4) 1-indexed int, disp: (2N,) f32 -> (10, r_total, 128)."""
    nodes = jnp.asarray(nodes, jnp.float32)
    disp = jnp.asarray(disp, jnp.float32)
    elem = np.asarray(elements, np.int64) - 1
    n0, n1, n2, n3 = elem[:, 0], elem[:, 1], elem[:, 2], elem[:, 3]

    ux = lambda n: disp[2 * n]
    uy = lambda n: disp[2 * n + 1]
    px = lambda n: nodes[n, 0]
    py = lambda n: nodes[n, 1]

    # Exact replication of __calc_element_energy__'s coordinate assembly:
    # x2 deliberately uses node-0's displacement (as in the original torch source).
    x1 = ux(n0) + px(n0)
    x2 = ux(n0) + px(n1)
    x3 = ux(n2) + px(n2)
    x4 = ux(n3) + px(n3)
    y1 = uy(n0) + py(n0)
    y2 = uy(n1) + py(n1)
    y3 = uy(n2) + py(n2)
    y4 = uy(n3) + py(n3)
    u3 = ux(n3)
    v3 = uy(n3)

    fields = jnp.stack([x2 - x1, x3 - x4, x4 - x1, x3 - x2,
                        y2 - y1, y3 - y4, y4 - y1, y3 - y2,
                        u3, v3], axis=0)                       # (10, E)

    E = elem.shape[0]
    E_pad = r_total * LANES
    if E_pad > E:
        # pad = unit-square diffs (det_j = 0.25 != 0) with u3 = v3 = 0 => te = 0 exactly.
        pad_col = jnp.array([1, 1, 0, 0, 0, 0, 1, 1, 0, 0], jnp.float32)[:, None]
        fields = jnp.concatenate([fields, jnp.tile(pad_col, (1, E_pad - E))], axis=1)
    return fields.astype(jnp.float32).reshape(NUM_FIELDS, r_total, LANES)


def build_bc_slab(disp, bcs):
    disp = jnp.asarray(disp, jnp.float32)
    vals, targs = [], []
    for node_ids, opt, bc_vals in bcs:
        off = 0 if opt == "u" else 1
        for nid, t in zip(node_ids, bc_vals):
            vals.append(disp[2 * (int(nid) - 1) + off])
            targs.append(float(t))
    B = len(vals)
    v = jnp.stack(vals) if B > 0 else jnp.zeros((0,), jnp.float32)
    t = jnp.asarray(targs, jnp.float32) if B > 0 else jnp.zeros((0,), jnp.float32)
    m = jnp.ones((B,), jnp.float32)
    slab = jnp.stack([v, t, m], axis=0)                         # (3, B)
    B_pad = max(LANES, _round_up(max(B, 1), LANES))
    if B_pad > B:
        slab = jnp.concatenate([slab, jnp.zeros((3, B_pad - B), jnp.float32)], axis=1)
    # pad rows to 8 so the (rows, lanes) block is sublane-aligned; extra rows are unused.
    slab = jnp.concatenate([slab, jnp.zeros((BC_ROWS - 3, B_pad), jnp.float32)], axis=0)
    return slab.astype(jnp.float32)


def optim_fem_forward(nodes, elements, disp, bcs, num_cores=None):
    if num_cores is None:
        num_cores = _detect_num_tensorcores()
    r_tile, tiles_per_core, r_total = plan_tiling(len(elements), num_cores)
    elem_slab = build_element_slab(nodes, elements, disp, r_total)
    bc_slab = build_bc_slab(disp, bcs)
    return fem_forward_pallas(elem_slab, bc_slab, r_tile, tiles_per_core, num_cores)


# ------------------------------- pure reference (f64) ---------------------------------
def reference_forward(nodes, elements, disp, bcs):
    nodes = np.asarray(nodes, np.float64)
    disp = np.asarray(disp, np.float64)
    elem = np.asarray(elements, np.int64) - 1
    energy = 0.0
    for e in range(elem.shape[0]):
        n = elem[e]
        ux = lambda k: disp[2 * n[k]]
        uy = lambda k: disp[2 * n[k] + 1]
        px = lambda k: nodes[n[k], 0]
        py = lambda k: nodes[n[k], 1]
        x = [ux(0) + px(0), ux(0) + px(1), ux(2) + px(2), ux(3) + px(3)]
        y = [uy(0) + py(0), uy(1) + py(1), uy(2) + py(2), uy(3) + py(3)]
        b06, b17 = 0.0, 0.0
        for i in range(4):
            dxi, deta = _shape_function_derivatives(GAUSS_XI[i], GAUSS_ETA[i])
            a = sum(dxi[k] * x[k] for k in range(4))
            b = sum(dxi[k] * y[k] for k in range(4))
            c = sum(deta[k] * x[k] for k in range(4))
            d = sum(deta[k] * y[k] for k in range(4))
            inv = 1.0 / (a * d - b * c)
            b06 += GAUSS_W[i] * (inv * d * dxi[3] + (-inv * c) * deta[3])
            b17 += GAUSS_W[i] * ((-inv * b) * dxi[3] + inv * a * deta[3])
        u3, v3 = ux(3), uy(3)
        eps_xx, eps_yy = b06 * u3, b17 * v3
        gamma = eps_xx + eps_yy
        c0 = E_MAT / (1 - NU * NU)
        sxx = c0 * (eps_xx + NU * eps_yy)
        syy = c0 * (eps_yy + NU * eps_xx)
        sxy = E_MAT / (1 + NU) * gamma
        te = 0.5 * (eps_xx * sxx + eps_yy * syy + 2 * gamma * sxy)
        energy += te * te
    bc_loss = 0.0
    for node_ids, opt, vals in bcs:
        off = 0 if opt == "u" else 1
        for nid, tval in zip(node_ids, vals):
            bc_loss += (disp[2 * (int(nid) - 1) + off] - float(tval)) ** 2
    return energy + bc_loss * BC_PENALTY


# ----------------------------------------- main ---------------------------------------
if __name__ == "__main__":
    # small 3x3 node grid -> 4 quad elements (node ids are 1-indexed, row-major)
    nrow = 3
    nodes = np.array([[c * 1.0, r * 1.0] for r in range(nrow) for c in range(nrow)],
                     dtype=np.float32)                      # (9, 2)
    nid = lambda r, c: r * nrow + c + 1
    elements = np.array([[nid(r, c), nid(r, c + 1), nid(r + 1, c + 1), nid(r + 1, c)]
                         for r in range(nrow - 1) for c in range(nrow - 1)],
                        dtype=np.int64)                      # (4, 4)

    num_nodes = nodes.shape[0]
    key = jax.random.PRNGKey(0)
    # deterministic stand-in for nn.ParameterList of randn(1)*0.1 per DOF
    disp = (jax.random.normal(key, (2 * num_nodes,), dtype=jnp.float32) * 0.1)

    bcs = [
        ([1, 4, 7], "u", [0.0, 0.0, 0.0]),
        ([1, 2, 3], "v", [0.01, 0.0, 0.0]),
    ]

    out = optim_fem_forward(nodes, elements, disp, bcs)
    out = jax.block_until_ready(out)

    ref = reference_forward(nodes, elements, disp, bcs)
    np.testing.assert_allclose(np.asarray(out)[0], ref, rtol=1e-3)

    print("KERNEL_OK")
</pallas_src>

<mosaic_0001>
module attributes {stable_mosaic.version = 11 : i64} {
  func.func @fem_energy_kernel(%arg0: i32, %arg1: i32, %arg2: memref<10x8x128xf32, #tpu.memory_space<vmem>>, %arg3: memref<8x128xf32, #tpu.memory_space<vmem>>, %arg4: memref<1x8x128xf32, #tpu.memory_space<vmem>>, %arg5: memref<8x128xf32, #tpu.memory_space<vmem>>) attributes {dimension_semantics = [#tpu.dimension_semantics<arbitrary>, #tpu.dimension_semantics<arbitrary>], iteration_bounds = array<i64: 1, 1>, scalar_prefetch = 0 : i64, scratch_operands = 1 : i64, tpu.core_type = #tpu.core_type<tc>, window_params = [{transform_indices = @transform_0, window_bounds = array<i64: 10, 8, 128>}, {pipeline_mode = #tpu.pipeline_mode<synchronous>, transform_indices = @transform_1, window_bounds = array<i64: 8, 128>}, {transform_indices = @transform_2, window_bounds = array<i64: 1, 8, 128>}]} {
    %c0_i32 = arith.constant 0 : i32
    %0 = arith.cmpi eq, %arg1, %c0_i32 : i32
    %1 = arith.extui %0 : i1 to i32
    %c0_i32_0 = arith.constant 0 : i32
    %2 = arith.cmpi ne, %1, %c0_i32_0 : i32
    scf.if %2 {
      %cst_81 = arith.constant 0.000000e+00 : f32
      %209 = vector.broadcast %cst_81 : f32 to vector<8x128xf32>
      %c0_82 = arith.constant 0 : index
      %c0_83 = arith.constant 0 : index
      %210 = vector.load %arg5[%c0_82, %c0_83] : memref<8x128xf32, #tpu.memory_space<vmem>>, vector<8x128xf32>
      tpu.vector_store %arg5[%c0_82, %c0_83], %209 {strides = array<i32>} : memref<8x128xf32, #tpu.memory_space<vmem>>, vector<8x128xf32>,
    } else {
    }
    %c0 = arith.constant 0 : index
    %c0_1 = arith.constant 0 : index
    %c0_2 = arith.constant 0 : index
    %3 = vector.load %arg2[%c0, %c0_1, %c0_2] : memref<10x8x128xf32, #tpu.memory_space<vmem>>, vector<1x8x128xf32>
    %4 = vector.shape_cast %3 : vector<1x8x128xf32> to vector<8x128xf32>
    %c1 = arith.constant 1 : index
    %c0_3 = arith.constant 0 : index
    %c0_4 = arith.constant 0 : index
    %5 = vector.load %arg2[%c1, %c0_3, %c0_4] : memref<10x8x128xf32, #tpu.memory_space<vmem>>, vector<1x8x128xf32>
    %6 = vector.shape_cast %5 : vector<1x8x128xf32> to vector<8x128xf32>
    %c2 = arith.constant 2 : index
    %c0_5 = arith.constant 0 : index
    %c0_6 = arith.constant 0 : index
    %7 = vector.load %arg2[%c2, %c0_5, %c0_6] : memref<10x8x128xf32, #tpu.memory_space<vmem>>, vector<1x8x128xf32>
    %8 = vector.shape_cast %7 : vector<1x8x128xf32> to vector<8x128xf32>
    %c3 = arith.constant 3 : index
    %c0_7 = arith.constant 0 : index
    %c0_8 = arith.constant 0 : index
    %9 = vector.load %arg2[%c3, %c0_7, %c0_8] : memref<10x8x128xf32, #tpu.memory_space<vmem>>, vector<1x8x128xf32>
    %10 = vector.shape_cast %9 : vector<1x8x128xf32> to vector<8x128xf32>
    %c4 = arith.constant 4 : index
    %c0_9 = arith.constant 0 : index
    %c0_10 = arith.constant 0 : index
    %11 = vector.load %arg2[%c4, %c0_9, %c0_10] : memref<10x8x128xf32, #tpu.memory_space<vmem>>, vector<1x8x128xf32>
    %12 = vector.shape_cast %11 : vector<1x8x128xf32> to vector<8x128xf32>
    %c5 = arith.constant 5 : index
    %c0_11 = arith.constant 0 : index
    %c0_12 = arith.constant 0 : index
    %13 = vector.load %arg2[%c5, %c0_11, %c0_12] : memref<10x8x128xf32, #tpu.memory_space<vmem>>, vector<1x8x128xf32>
    %14 = vector.shape_cast %13 : vector<1x8x128xf32> to vector<8x128xf32>
    %c6 = arith.constant 6 : index
    %c0_13 = arith.constant 0 : index
    %c0_14 = arith.constant 0 : index
    %15 = vector.load %arg2[%c6, %c0_13, %c0_14] : memref<10x8x128xf32, #tpu.memory_space<vmem>>, vector<1x8x128xf32>
    %16 = vector.shape_cast %15 : vector<1x8x128xf32> to vector<8x128xf32>
    %c7 = arith.constant 7 : index
    %c0_15 = arith.constant 0 : index
    %c0_16 = arith.constant 0 : index
    %17 = vector.load %arg2[%c7, %c0_15, %c0_16] : memref<10x8x128xf32, #tpu.memory_space<vmem>>, vector<1x8x128xf32>
    %18 = vector.shape_cast %17 : vector<1x8x128xf32> to vector<8x128xf32>
    %c8 = arith.constant 8 : index
    %c0_17 = arith.constant 0 : index
    %c0_18 = arith.constant 0 : index
    %19 = vector.load %arg2[%c8, %c0_17, %c0_18] : memref<10x8x128xf32, #tpu.memory_space<vmem>>, vector<1x8x128xf32>
    %20 = vector.shape_cast %19 : vector<1x8x128xf32> to vector<8x128xf32>
    %c9 = arith.constant 9 : index
    %c0_19 = arith.constant 0 : index
    %c0_20 = arith.constant 0 : index
    %21 = vector.load %arg2[%c9, %c0_19, %c0_20] : memref<10x8x128xf32, #tpu.memory_space<vmem>>, vector<1x8x128xf32>
    %22 = vector.shape_cast %21 : vector<1x8x128xf32> to vector<8x128xf32>
    %cst = arith.constant 0.394337565 : f32
    %23 = vector.broadcast %cst : f32 to vector<8x128xf32>
    %24 = arith.mulf %23, %4 : vector<8x128xf32>
    %cst_21 = arith.constant 0.105662435 : f32
    %25 = vector.broadcast %cst_21 : f32 to vector<8x128xf32>
    %26 = arith.mulf %25, %6 : vector<8x128xf32>
    %27 = arith.addf %24, %26 : vector<8x128xf32>
    %cst_22 = arith.constant 0.394337565 : f32
    %28 = vector.broadcast %cst_22 : f32 to vector<8x128xf32>
    %29 = arith.mulf %28, %12 : vector<8x128xf32>
    %cst_23 = arith.constant 0.105662435 : f32
    %30 = vector.broadcast %cst_23 : f32 to vector<8x128xf32>
    %31 = arith.mulf %30, %14 : vector<8x128xf32>
    %32 = arith.addf %29, %31 : vector<8x128xf32>
    %cst_24 = arith.constant 0.394337565 : f32
    %33 = vector.broadcast %cst_24 : f32 to vector<8x128xf32>
    %34 = arith.mulf %33, %8 : vector<8x128xf32>
    %cst_25 = arith.constant 0.105662435 : f32
    %35 = vector.broadcast %cst_25 : f32 to vector<8x128xf32>
    %36 = arith.mulf %35, %10 : vector<8x128xf32>
    %37 = arith.addf %34, %36 : vector<8x128xf32>
    %cst_26 = arith.constant 0.394337565 : f32
    %38 = vector.broadcast %cst_26 : f32 to vector<8x128xf32>
    %39 = arith.mulf %38, %16 : vector<8x128xf32>
    %cst_27 = arith.constant 0.105662435 : f32
    %40 = vector.broadcast %cst_27 : f32 to vector<8x128xf32>
    %41 = arith.mulf %40, %18 : vector<8x128xf32>
    %42 = arith.addf %39, %41 : vector<8x128xf32>
    %43 = arith.mulf %27, %42 : vector<8x128xf32>
    %44 = arith.mulf %32, %37 : vector<8x128xf32>
    %45 = arith.subf %43, %44 : vector<8x128xf32>
    %46 = tpu.reciprocal %45 {approx = true} : vector<8x128xf32> -> vector<8x128xf32>
    %47 = arith.mulf %45, %46 : vector<8x128xf32>
    %cst_28 = arith.constant 2.000000e+00 : f32
    %48 = vector.broadcast %cst_28 : f32 to vector<8x128xf32>
    %49 = arith.subf %48, %47 : vector<8x128xf32>
    %50 = arith.mulf %46, %49 : vector<8x128xf32>
    %cst_29 = arith.constant -0.105662435 : f32
    %51 = vector.broadcast %cst_29 : f32 to vector<8x128xf32>
    %52 = arith.mulf %42, %51 : vector<8x128xf32>
    %cst_30 = arith.constant 0.394337565 : f32
    %53 = vector.broadcast %cst_30 : f32 to vector<8x128xf32>
    %54 = arith.mulf %37, %53 : vector<8x128xf32>
    %55 = arith.subf %52, %54 : vector<8x128xf32>
    %56 = arith.mulf %50, %55 : vector<8x128xf32>
    %cst_31 = arith.constant 0.394337565 : f32
    %57 = vector.broadcast %cst_31 : f32 to vector<8x128xf32>
    %58 = arith.mulf %27, %57 : vector<8x128xf32>
    %cst_32 = arith.constant -0.105662435 : f32
    %59 = vector.broadcast %cst_32 : f32 to vector<8x128xf32>
    %60 = arith.mulf %32, %59 : vector<8x128xf32>
    %61 = arith.subf %58, %60 : vector<8x128xf32>
    %62 = arith.mulf %50, %61 : vector<8x128xf32>
    %cst_33 = arith.constant 0.394337565 : f32
    %63 = vector.broadcast %cst_33 : f32 to vector<8x128xf32>
    %64 = arith.mulf %63, %4 : vector<8x128xf32>
    %cst_34 = arith.constant 0.105662435 : f32
    %65 = vector.broadcast %cst_34 : f32 to vector<8x128xf32>
    %66 = arith.mulf %65, %6 : vector<8x128xf32>
    %67 = arith.addf %64, %66 : vector<8x128xf32>
    %cst_35 = arith.constant 0.394337565 : f32
    %68 = vector.broadcast %cst_35 : f32 to vector<8x128xf32>
    %69 = arith.mulf %68, %12 : vector<8x128xf32>
    %cst_36 = arith.constant 0.105662435 : f32
    %70 = vector.broadcast %cst_36 : f32 to vector<8x128xf32>
    %71 = arith.mulf %70, %14 : vector<8x128xf32>
    %72 = arith.addf %69, %71 : vector<8x128xf32>
    %cst_37 = arith.constant 0.105662435 : f32
    %73 = vector.broadcast %cst_37 : f32 to vector<8x128xf32>
    %74 = arith.mulf %73, %8 : vector<8x128xf32>
    %cst_38 = arith.constant 0.394337565 : f32
    %75 = vector.broadcast %cst_38 : f32 to vector<8x128xf32>
    %76 = arith.mulf %75, %10 : vector<8x128xf32>
    %77 = arith.addf %74, %76 : vector<8x128xf32>
    %cst_39 = arith.constant 0.105662435 : f32
    %78 = vector.broadcast %cst_39 : f32 to vector<8x128xf32>
    %79 = arith.mulf %78, %16 : vector<8x128xf32>
    %cst_40 = arith.constant 0.394337565 : f32
    %80 = vector.broadcast %cst_40 : f32 to vector<8x128xf32>
    %81 = arith.mulf %80, %18 : vector<8x128xf32>
    %82 = arith.addf %79, %81 : vector<8x128xf32>
    %83 = arith.mulf %67, %82 : vector<8x128xf32>
    %84 = arith.mulf %72, %77 : vector<8x128xf32>
    %85 = arith.subf %83, %84 : vector<8x128xf32>
    %86 = tpu.reciprocal %85 {approx = true} : vector<8x128xf32> -> vector<8x128xf32>
    %87 = arith.mulf %85, %86 : vector<8x128xf32>
    %cst_41 = arith.constant 2.000000e+00 : f32
    %88 = vector.broadcast %cst_41 : f32 to vector<8x128xf32>
    %89 = arith.subf %88, %87 : vector<8x128xf32>
    %90 = arith.mulf %86, %89 : vector<8x128xf32>
    %cst_42 = arith.constant -0.105662435 : f32
    %91 = vector.broadcast %cst_42 : f32 to vector<8x128xf32>
    %92 = arith.mulf %82, %91 : vector<8x128xf32>
    %cst_43 = arith.constant 0.105662435 : f32
    %93 = vector.broadcast %cst_43 : f32 to vector<8x128xf32>
    %94 = arith.mulf %77, %93 : vector<8x128xf32>
    %95 = arith.subf %92, %94 : vector<8x128xf32>
    %96 = arith.mulf %90, %95 : vector<8x128xf32>
    %cst_44 = arith.constant 0.105662435 : f32
    %97 = vector.broadcast %cst_44 : f32 to vector<8x128xf32>
    %98 = arith.mulf %67, %97 : vector<8x128xf32>
    %cst_45 = arith.constant -0.105662435 : f32
    %99 = vector.broadcast %cst_45 : f32 to vector<8x128xf32>
    %100 = arith.mulf %72, %99 : vector<8x128xf32>
    %101 = arith.subf %98, %100 : vector<8x128xf32>
    %102 = arith.mulf %90, %101 : vector<8x128xf32>
    %103 = arith.addf %56, %96 : vector<8x128xf32>
    %104 = arith.addf %62, %102 : vector<8x128xf32>
    %cst_46 = arith.constant 0.105662435 : f32
    %105 = vector.broadcast %cst_46 : f32 to vector<8x128xf32>
    %106 = arith.mulf %105, %4 : vector<8x128xf32>
    %cst_47 = arith.constant 0.394337565 : f32
    %107 = vector.broadcast %cst_47 : f32 to vector<8x128xf32>
    %108 = arith.mulf %107, %6 : vector<8x128xf32>
    %109 = arith.addf %106, %108 : vector<8x128xf32>
    %cst_48 = arith.constant 0.105662435 : f32
    %110 = vector.broadcast %cst_48 : f32 to vector<8x128xf32>
    %111 = arith.mulf %110, %12 : vector<8x128xf32>
    %cst_49 = arith.constant 0.394337565 : f32
    %112 = vector.broadcast %cst_49 : f32 to vector<8x128xf32>
    %113 = arith.mulf %112, %14 : vector<8x128xf32>
    %114 = arith.addf %111, %113 : vector<8x128xf32>
    %cst_50 = arith.constant 0.105662435 : f32
    %115 = vector.broadcast %cst_50 : f32 to vector<8x128xf32>
    %116 = arith.mulf %115, %8 : vector<8x128xf32>
    %cst_51 = arith.constant 0.394337565 : f32
    %117 = vector.broadcast %cst_51 : f32 to vector<8x128xf32>
    %118 = arith.mulf %117, %10 : vector<8x128xf32>
    %119 = arith.addf %116, %118 : vector<8x128xf32>
    %cst_52 = arith.constant 0.105662435 : f32
    %120 = vector.broadcast %cst_52 : f32 to vector<8x128xf32>
    %121 = arith.mulf %120, %16 : vector<8x128xf32>
    %cst_53 = arith.constant 0.394337565 : f32
    %122 = vector.broadcast %cst_53 : f32 to vector<8x128xf32>
    %123 = arith.mulf %122, %18 : vector<8x128xf32>
    %124 = arith.addf %121, %123 : vector<8x128xf32>
    %125 = arith.mulf %109, %124 : vector<8x128xf32>
    %126 = arith.mulf %114, %119 : vector<8x128xf32>
    %127 = arith.subf %125, %126 : vector<8x128xf32>
    %128 = tpu.reciprocal %127 {approx = true} : vector<8x128xf32> -> vector<8x128xf32>
    %129 = arith.mulf %127, %128 : vector<8x128xf32>
    %cst_54 = arith.constant 2.000000e+00 : f32
    %130 = vector.broadcast %cst_54 : f32 to vector<8x128xf32>
    %131 = arith.subf %130, %129 : vector<8x128xf32>
    %132 = arith.mulf %128, %131 : vector<8x128xf32>
    %cst_55 = arith.constant -0.394337565 : f32
    %133 = vector.broadcast %cst_55 : f32 to vector<8x128xf32>
    %134 = arith.mulf %124, %133 : vector<8x128xf32>
    %cst_56 = arith.constant 0.105662435 : f32
    %135 = vector.broadcast %cst_56 : f32 to vector<8x128xf32>
    %136 = arith.mulf %119, %135 : vector<8x128xf32>
    %137 = arith.subf %134, %136 : vector<8x128xf32>
    %138 = arith.mulf %132, %137 : vector<8x128xf32>
    %cst_57 = arith.constant 0.105662435 : f32
    %139 = vector.broadcast %cst_57 : f32 to vector<8x128xf32>
    %140 = arith.mulf %109, %139 : vector<8x128xf32>
    %cst_58 = arith.constant -0.394337565 : f32
    %141 = vector.broadcast %cst_58 : f32 to vector<8x128xf32>
    %142 = arith.mulf %114, %141 : vector<8x128xf32>
    %143 = arith.subf %140, %142 : vector<8x128xf32>
    %144 = arith.mulf %132, %143 : vector<8x128xf32>
    %145 = arith.addf %103, %138 : vector<8x128xf32>
    %146 = arith.addf %104, %144 : vector<8x128xf32>
    %cst_59 = arith.constant 0.105662435 : f32
    %147 = vector.broadcast %cst_59 : f32 to vector<8x128xf32>
    %148 = arith.mulf %147, %4 : vector<8x128xf32>
    %cst_60 = arith.constant 0.394337565 : f32
    %149 = vector.broadcast %cst_60 : f32 to vector<8x128xf32>
    %150 = arith.mulf %149, %6 : vector<8x128xf32>
    %151 = arith.addf %148, %150 : vector<8x128xf32>
    %cst_61 = arith.constant 0.105662435 : f32
    %152 = vector.broadcast %cst_61 : f32 to vector<8x128xf32>
    %153 = arith.mulf %152, %12 : vector<8x128xf32>
    %cst_62 = arith.constant 0.394337565 : f32
    %154 = vector.broadcast %cst_62 : f32 to vector<8x128xf32>
    %155 = arith.mulf %154, %14 : vector<8x128xf32>
    %156 = arith.addf %153, %155 : vector<8x128xf32>
    %cst_63 = arith.constant 0.394337565 : f32
    %157 = vector.broadcast %cst_63 : f32 to vector<8x128xf32>
    %158 = arith.mulf %157, %8 : vector<8x128xf32>
    %cst_64 = arith.constant 0.105662435 : f32
    %159 = vector.broadcast %cst_64 : f32 to vector<8x128xf32>
    %160 = arith.mulf %159, %10 : vector<8x128xf32>
    %161 = arith.addf %158, %160 : vector<8x128xf32>
    %cst_65 = arith.constant 0.394337565 : f32
    %162 = vector.broadcast %cst_65 : f32 to vector<8x128xf32>
    %163 = arith.mulf %162, %16 : vector<8x128xf32>
    %cst_66 = arith.constant 0.105662435 : f32
    %164 = vector.broadcast %cst_66 : f32 to vector<8x128xf32>
    %165 = arith.mulf %164, %18 : vector<8x128xf32>
    %166 = arith.addf %163, %165 : vector<8x128xf32>
    %167 = arith.mulf %151, %166 : vector<8x128xf32>
    %168 = arith.mulf %156, %161 : vector<8x128xf32>
    %169 = arith.subf %167, %168 : vector<8x128xf32>
    %170 = tpu.reciprocal %169 {approx = true} : vector<8x128xf32> -> vector<8x128xf32>
    %171 = arith.mulf %169, %170 : vector<8x128xf32>
    %cst_67 = arith.constant 2.000000e+00 : f32
    %172 = vector.broadcast %cst_67 : f32 to vector<8x128xf32>
    %173 = arith.subf %172, %171 : vector<8x128xf32>
    %174 = arith.mulf %170, %173 : vector<8x128xf32>
    %cst_68 = arith.constant -0.394337565 : f32
    %175 = vector.broadcast %cst_68 : f32 to vector<8x128xf32>
    %176 = arith.mulf %166, %175 : vector<8x128xf32>
    %cst_69 = arith.constant 0.394337565 : f32
    %177 = vector.broadcast %cst_69 : f32 to vector<8x128xf32>
    %178 = arith.mulf %161, %177 : vector<8x128xf32>
    %179 = arith.subf %176, %178 : vector<8x128xf32>
    %180 = arith.mulf %174, %179 : vector<8x128xf32>
    %cst_70 = arith.constant 0.394337565 : f32
    %181 = vector.broadcast %cst_70 : f32 to vector<8x128xf32>
    %182 = arith.mulf %151, %181 : vector<8x128xf32>
    %cst_71 = arith.constant -0.394337565 : f32
    %183 = vector.broadcast %cst_71 : f32 to vector<8x128xf32>
    %184 = arith.mulf %156, %183 : vector<8x128xf32>
    %185 = arith.subf %182, %184 : vector<8x128xf32>
    %186 = arith.mulf %174, %185 : vector<8x128xf32>
    %187 = arith.addf %145, %180 : vector<8x128xf32>
    %188 = arith.addf %146, %186 : vector<8x128xf32>
    %189 = arith.mulf %187, %20 : vector<8x128xf32>
    %190 = arith.mulf %188, %22 : vector<8x128xf32>
    %191 = arith.mulf %189, %189 : vector<8x128xf32>
    %192 = arith.mulf %190, %190 : vector<8x128xf32>
    %193 = arith.addf %191, %192 : vector<8x128xf32>
    %cst_72 = arith.constant 1318.68127 : f32
    %194 = vector.broadcast %cst_72 : f32 to vector<8x128xf32>
    %195 = arith.mulf %194, %193 : vector<8x128xf32>
    %196 = arith.mulf %189, %190 : vector<8x128xf32>
    %cst_73 = arith.constant 1868.13184 : f32
    %197 = vector.broadcast %cst_73 : f32 to vector<8x128xf32>
    %198 = arith.mulf %197, %196 : vector<8x128xf32>
    %199 = arith.addf %195, %198 : vector<8x128xf32>
    %200 = arith.mulf %199, %199 : vector<8x128xf32>
    %c0_74 = arith.constant 0 : index
    %c0_75 = arith.constant 0 : index
    %201 = vector.load %arg5[%c0_74, %c0_75] : memref<8x128xf32, #tpu.memory_space<vmem>>, vector<8x128xf32>
    %202 = vector.shape_cast %200 : vector<8x128xf32> to vector<1x8x128xf32>
    %cst_76 = arith.constant dense<0.000000e+00> : vector<8x128xf32>
    %203 = vector.multi_reduction <add>, %202, %cst_76 [0] : vector<1x8x128xf32> to vector<8x128xf32>
    %204 = arith.addf %201, %203 : vector<8x128xf32>
    %c0_77 = arith.constant 0 : index
    %c0_78 = arith.constant 0 : index
    %205 = vector.load %arg5[%c0_77, %c0_78] : memref<8x128xf32, #tpu.memory_space<vmem>>, vector<8x128xf32>
    tpu.vector_store %arg5[%c0_77, %c0_78], %204 {strides = array<i32>} : memref<8x128xf32, #tpu.memory_space<vmem>>, vector<8x128xf32>,
    %c0_i32_79 = arith.constant 0 : i32
    %206 = arith.cmpi eq, %arg1, %c0_i32_79 : i32
    %207 = arith.extui %206 : i1 to i32
    %c0_i32_80 = arith.constant 0 : i32
    %208 = arith.cmpi ne, %207, %c0_i32_80 : i32
    scf.if %208 {
      %c0_81 = arith.constant 0 : index
      %c0_82 = arith.constant 0 : index
      %209 = vector.load %arg3[%c0_81, %c0_82] : memref<8x128xf32, #tpu.memory_space<vmem>>, vector<8x128xf32>
      %210 = vector.extract_strided_slice %209 {offsets = [0, 0], sizes = [1, 128], strides = [1, 1]} : vector<8x128xf32> to vector<1x128xf32>
      %211 = vector.extract_strided_slice %209 {offsets = [1, 0], sizes = [1, 128], strides = [1, 1]} : vector<8x128xf32> to vector<1x128xf32>
      %212 = arith.subf %210, %211 : vector<1x128xf32>
      %213 = vector.extract_strided_slice %209 {offsets = [2, 0], sizes = [1, 128], strides = [1, 1]} : vector<8x128xf32> to vector<1x128xf32>
      %214 = arith.mulf %213, %212 : vector<1x128xf32>
      %215 = arith.mulf %214, %212 : vector<1x128xf32>
      %216 = vector.shape_cast %215 : vector<1x128xf32> to vector<1x1x128xf32>
      %cst_83 = arith.constant dense<0.000000e+00> : vector<1xf32>
      %217 = vector.multi_reduction <add>, %216, %cst_83 [1, 2] : vector<1x1x128xf32> to vector<1xf32>
      %218 = vector.shape_cast %217 : vector<1xf32> to vector<1x1x1xf32>
      %219 = vector.extract %218[0, 0, 0] : f32 from vector<1x1x1xf32>
      %c0_i32_84 = arith.constant 0 : i32
      %220 = arith.cmpi eq, %arg0, %c0_i32_84 : i32
      %221 = arith.extui %220 : i1 to i32
      %222 = arith.sitofp %221 : i32 to f32
      %c0_85 = arith.constant 0 : index
      %c0_86 = arith.constant 0 : index
      %223 = vector.load %arg5[%c0_85, %c0_86] : memref<8x128xf32, #tpu.memory_space<vmem>>, vector<8x128xf32>
      %224 = vector.shape_cast %223 : vector<8x128xf32> to vector<1x8x128xf32>
      %cst_87 = arith.constant dense<0.000000e+00> : vector<1xf32>
      %225 = vector.multi_reduction <add>, %224, %cst_87 [1, 2] : vector<1x8x128xf32> to vector<1xf32>
      %226 = vector.shape_cast %225 : vector<1xf32> to vector<1x1x1xf32>
      %227 = vector.extract %226[0, 0, 0] : f32 from vector<1x1x1xf32>
      %cst_88 = arith.constant 1.000000e+10 : f32
      %228 = arith.mulf %222, %cst_88 : f32
      %229 = arith.mulf %228, %219 : f32
      %230 = arith.addf %227, %229 : f32
      %cst_89 = arith.constant 0.000000e+00 : f32
      %231 = vector.broadcast %cst_89 : f32 to vector<1x8x128xf32>
      %232 = vector.broadcast %230 : f32 to vector<1x8x128xf32>
      %233 = arith.addf %231, %232 : vector<1x8x128xf32>
      %c0_90 = arith.constant 0 : index
      %c0_91 = arith.constant 0 : index
      %c0_92 = arith.constant 0 : index
      %234 = vector.load %arg4[%c0_90, %c0_91, %c0_92] : memref<1x8x128xf32, #tpu.memory_space<vmem>>, vector<1x8x128xf32>
      tpu.vector_store %arg4[%c0_90, %c0_91, %c0_92], %233 {strides = array<i32>} : memref<1x8x128xf32, #tpu.memory_space<vmem>>, vector<1x8x128xf32>,
    } else {
    }
    return
  }
  func.func @transform_0(%arg0: i32, %arg1: i32) -> (i32, i32, i32) {
    %c1_i32 = arith.constant 1 : i32
    %0 = arith.muli %arg0, %c1_i32 : i32
    %1 = arith.addi %0, %arg1 : i32
    %c0_i32 = arith.constant 0 : i32
    %c0_i32_0 = arith.constant 0 : i32
    %c0_i32_1 = arith.constant 0 : i32
    return %c0_i32, %1, %c0_i32_0 : i32, i32, i32
  }
  func.func @transform_1(%arg0: i32, %arg1: i32) -> (i32, i32) {
    %c0_i32 = arith.constant 0 : i32
    %c0_i32_0 = arith.constant 0 : i32
    %c0_i32_1 = arith.constant 0 : i32
    return %c0_i32, %c0_i32_0 : i32, i32
  }
  func.func @transform_2(%arg0: i32, %arg1: i32) -> (i32, i32, i32) {
    %c0_i32 = arith.constant 0 : i32
    %c0_i32_0 = arith.constant 0 : i32
    %c0_i32_1 = arith.constant 0 : i32
    return %arg0, %c0_i32, %c0_i32_0 : i32, i32, i32
  }
}

</mosaic_0001>

<bundles_post_ra>
// kernel: tpu_custom_call.1
= control target key start
LH: loop header
LB: loop body
LE: loop exit
PB: predicated region body
PF: predicated region fallthrough
CT: control target
= control target key end

     0   :  { %7 = vsyncpa [#allocation4], 0  ;;  %s373_s0 = inlined_call_operand.hbm [shape: f32[10,8,128], index: 0, kind: input, shape index: {}]   ;;  %s374_s1 = inlined_call_operand.hbm [shape: f32[8,128], index: 1, kind: input, shape index: {}]   ;;  %s375_s2 = inlined_call_operand.hbm [shape: f32[1,8,128], index: 2, kind: output, shape index: {}]  }
   0x1   :  { %8 = vsyncpa [#allocation7], 0 }
   0x2   :  { %9 = vsyncpa [#allocation5], 0  ;;  %s317_s9 = smov [#allocation3]   ;;  %s245_s13 = scalar_lea.hbm %s373_s0, 1280 }
   0x3   :  { %s18_s10 = sshll.u32 %s317_s9, 4  ;;  %p246_p0 = scmp.ne.s32.totalorder %s373_s0, %s245_s13  ;;  %s19_s10 = int_to_ptr.vmem [resolvable:$true] %s18_s10 }
   0x4   :  { %p249_p1 = scmp.lt.u32.totalorder %s245_s13, %s373_s0 }
   0x6   :  { %p251_p2 = pnand %p249_p1, %p246_p0 }
   0x8   :  { %254 = shalt.err (!%p251_p2)
}
   0x9   :  { %s255_s18 = scalar_lea.vmem %s19_s10, 1280  ;;  %p260_p4 = scmp.lt.s32.totalorder %s19_s10, %s19_s10 }
   0xa   :  { %p256_p3 = scmp.ne.s32.totalorder %s19_s10, %s255_s18  ;;  %p261_p5 = scmp.lt.s32.totalorder %s255_s18, %s255_s18 }
   0xc   :  { %p262_p6 = por %p261_p5, %p260_p4 }
   0xe   :  { %p263_p7 = pnand %p262_p6, %p256_p3 }
  0x10   :  { %266 = shalt.err (!%p263_p7)
}
  0x11   :  { %s318_s19 = smov 128   ;;  %s319_s20 = smov 8  }
  0x12   :  { %24 = dma.hbm_to_vmem [thread:$0]  %s373_s0, 1280, %s19_s10, [#allocation4], %s318_s19, %s318_s19, %s319_s20  }
  0x13   :  { %s320_s23 = smov [#allocation6]   ;;  %s267_s27 = scalar_lea.hbm %s374_s1, 128 }
  0x14   :  { %s31_s24 = sshll.u32 %s320_s23, 4  ;;  %p268_p8 = scmp.ne.s32.totalorder %s374_s1, %s267_s27  ;;  %s32_s24 = int_to_ptr.vmem [resolvable:$true] %s31_s24 }
  0x15   :  { %p271_p9 = scmp.lt.u32.totalorder %s267_s27, %s374_s1 }
  0x17   :  { %p273_p10 = pnand %p271_p9, %p268_p8 }
  0x19   :  { %276 = shalt.err (!%p273_p10)
}
  0x1a   :  { %s277_s4 = scalar_lea.vmem %s32_s24, 128  ;;  %p282_p12 = scmp.lt.s32.totalorder %s32_s24, %s32_s24 }
  0x1b   :  { %p278_p11 = scmp.ne.s32.totalorder %s32_s24, %s277_s4  ;;  %p283_p13 = scmp.lt.s32.totalorder %s277_s4, %s277_s4 }
  0x1d   :  { %p284_p0 = por %p283_p13, %p282_p12 }
  0x1f   :  { %p285_p1 = pnand %p284_p0, %p278_p11 }
  0x21   :  { %288 = shalt.err (!%p285_p1)
}
  0x22   :  { %34 = dma.hbm_to_vmem [thread:$0]  %s374_s1, 128, %s32_s24, [#allocation7]  }
  0x23   :  { %311 = dma.done.wait [#allocation4], 1280  }
  0x24   :  { %312 = vsyncadd [#allocation4], 4294966016 }
  0x25   :  { %313 = dma.done.wait [#allocation7], 128  }
  0x26   :  { %314 = vsyncadd [#allocation7], 4294967168  ;;  %v169_v0 = vld [vmem:[#allocation6] sm:$0xff]  ;;  %v47_v1 = vld [vmem:[#allocation3] sm:$0xff]  ;;  %vm182_vm0 = vcmask 1040384   ;;  %s321_s7 = smov [#allocation8]  }
  0x27   :  { %v49_v2 = vld [vmem:[#allocation3 + $0x8] sm:$0xff]  ;;  %v171_v3 = vrot.slane %v169_v0, 1  ;;  %v51_v4 = vld [vmem:[#allocation3 + $0x10] sm:$0xff]  ;;  %v53_v5 = vld [vmem:[#allocation3 + $0x18] sm:$0xff]  ;;  %v66_v7 = vmul.f32 0.39433756, %v47_v1 }
  0x28   :  { %v55_v6 = vld [vmem:[#allocation3 + $0x20] sm:$0xff]  ;;  %v57_v8 = vld [vmem:[#allocation3 + $0x28] sm:$0xff]  ;;  %v59_v9 = vld [vmem:[#allocation3 + $0x30] sm:$0xff]  ;;  %v67_v11 = vmul.f32 0.105662435, %v49_v2  ;;  %s218_s8 = sshll.u32 %s321_s7, 4  ;;  %s219_s8 = int_to_ptr.vmem [resolvable:$true] %s218_s8 }
  0x29   :  { %v61_v10 = vld [vmem:[#allocation3 + $0x38] sm:$0xff]  ;;  %v173_v12 = vsub.f32 %v169_v0, %v171_v3  ;;  %v69_v13 = vmul.f32 0.39433756, %v55_v6  ;;  %v70_v14 = vmul.f32 0.105662435, %v57_v8  ;;  %s289_s11 = scalar_lea.vmem %s219_s8, 128  ;;  %p294_p3 = scmp.lt.s32.totalorder %s219_s8, %s219_s8 }
  0x2a   :  { %v68_v15 = vadd.f32 %v67_v11, %v66_v7  ;;  %v72_v16 = vmul.f32 0.39433756, %v51_v4  ;;  %v73_v17 = vmul.f32 0.105662435, %v53_v5  ;;  %v75_v18 = vmul.f32 0.39433756, %v59_v9  ;;  %p290_p2 = scmp.ne.s32.totalorder %s219_s8, %s289_s11  ;;  %p295_p4 = scmp.lt.s32.totalorder %s289_s11, %s289_s11 }
  0x2b   :  { %v175_v19 = vrot.slane %v173_v12, 6  ;;  %v71_v20 = vadd.f32 %v70_v14, %v69_v13  ;;  %v76_v21 = vmul.f32 0.105662435, %v61_v10  ;;  %v93_v22 = vmul.f32 0.105662435, %v51_v4 }
  0x2c   :  { %v74_v23 = vadd.f32 %v73_v17, %v72_v16  ;;  %v94_v24 = vmul.f32 0.39433756, %v53_v5  ;;  %v96_v25 = vmul.f32 0.105662435, %v59_v9  ;;  %v97_v28 = vmul.f32 0.39433756, %v61_v10  ;;  %p296_p5 = por %p295_p4, %p294_p3 }
  0x2d   :  { %v177_v26 = vmul.f32 %v175_v19, %v169_v0  ;;  %v77_v27 = vadd.f32 %v76_v21, %v75_v18  ;;  %v115_v37 = vmul.f32 0.105662435, %v47_v1  ;;  %v116_v39 = vmul.f32 0.39433756, %v49_v2 }
  0x2e   :  { %v79_v29 = vmul.f32 %v74_v23, %v71_v20  ;;  %v95_v30 = vadd.f32 %v94_v24, %v93_v22  ;;  %v98_v33 = vadd.f32 %v97_v28, %v96_v25  ;;  %v118_v40 = vmul.f32 0.105662435, %v55_v6  ;;  %p297_p6 = pnand %p296_p5, %p290_p2 }
  0x2f   :  { %v178_v31 = vmul.f32 %v177_v26, %v175_v19  ;;  %v78_v32 = vmul.f32 %v77_v27, %v68_v15  ;;  %v119_v42 = vmul.f32 0.39433756, %v57_v8  ;;  %v117_v44 = vadd.f32 %v116_v39, %v115_v37  ;;  %v65_v37 = vld [vmem:[#allocation3 + $0x48] sm:$0xff] }
  0x30   :  { %v100_v34 = vmul.f32 %v95_v30, %v71_v20  ;;  %v99_v38 = vmul.f32 %v98_v33, %v68_v15  ;;  %v89_v53 = vmul.f32 0.39433756, %v68_v15  ;;  %v85_v55 = vmul.f32 -0.105662435, %v77_v27 }
  0x31   :  { %v180_v35 = vrot.slane %v178_v31, 2  ;;  %v80_v36 = vsub.f32 %v78_v32, %v79_v29  ;;  %v120_v45 = vadd.f32 %v119_v42, %v118_v40  ;;  %v121_v46 = vmul.f32 %v117_v44, %v98_v33 }
  0x32   :  { %v101_v43 = vsub.f32 %v99_v38, %v100_v34  ;;  %v137_v47 = vmul.f32 %v117_v44, %v77_v27  ;;  %v86_v56 = vmul.f32 0.39433756, %v74_v23  ;;  %v90_v57 = vmul.f32 -0.105662435, %v71_v20 }
  0x33   :  { %v183_v41 = vsel %vm182_vm0, %v180_v35, 0.0  ;;  %237 = vrcp.f32 %v80_v36  ;;  %v122_v48 = vmul.f32 %v120_v45, %v95_v30  ;;  %v138_v49 = vmul.f32 %v120_v45, %v74_v23 }
  0x34   :  { %184 = vadd.xlane.f32.xlu0 %v183_v41  ;;  %239 = vrcp.f32 %v101_v43  ;;  %v106_v58 = vmul.f32 -0.105662435, %v98_v33  ;;  %v107_v59 = vmul.f32 0.105662435, %v95_v30  ;;  %v110_v60 = vmul.f32 0.105662435, %v68_v15 }
  0x35   :  { %v123_v50 = vsub.f32 %v121_v46, %v122_v48  ;;  %v139_v51 = vsub.f32 %v137_v47, %v138_v49  ;;  %v87_v1 = vsub.f32 %v85_v55, %v86_v56  ;;  %v91_v2 = vsub.f32 %v89_v53, %v90_v57 }
  0x36   :  { %v108_v4 = vsub.f32 %v106_v58, %v107_v59  ;;  %v111_v5 = vsub.f32 %v110_v60, %v90_v57  ;;  %v128_v6 = vmul.f32 -0.39433756, %v98_v33  ;;  %v131_v7 = vmul.f32 0.105662435, %v117_v44 }
  0x37   :  { %241 = vrcp.f32 %v123_v50  ;;  %v132_v8 = vmul.f32 -0.39433756, %v120_v45  ;;  %v144_v11 = vmul.f32 -0.39433756, %v77_v27  ;;  %v147_v12 = vmul.f32 0.39433756, %v117_v44 }
  0x38   :  { %243 = vrcp.f32 %v139_v51  ;;  %v129_v21 = vsub.f32 %v128_v6, %v107_v59 }
  0x39   :  { %v133_v22 = vsub.f32 %v131_v7, %v132_v8  ;;  %v145_v24 = vsub.f32 %v144_v11, %v86_v56  ;;  %v148_v25 = vsub.f32 %v147_v12, %v132_v8 }
  0x3d   :  { %v238_v52 = vpop.eup %237 }
  0x3e   :  { %v82_v54 = vmul.f32 %v238_v52, %v80_v36  ;;  %v240_v61 = vpop.eup %239  ;;  %v63_v36 = vld [vmem:[#allocation3 + $0x40] sm:$0xff] }
  0x3f   :  { %v103_v63 = vmul.f32 %v240_v61, %v101_v43 }
  0x40   :  { %v83_v62 = vsub.f32 2.0, %v82_v54 }
  0x41   :  { %v104_v3 = vsub.f32 2.0, %v103_v63  ;;  %v242_v9 = vpop.eup %241 }
  0x42   :  { %v84_v0 = vmul.f32 %v238_v52, %v83_v62  ;;  %v244_v13 = vpop.eup %243  ;;  %v125_v15 = vmul.f32 %v242_v9, %v123_v50 }
  0x43   :  { %v105_v10 = vmul.f32 %v240_v61, %v104_v3  ;;  %v141_v19 = vmul.f32 %v244_v13, %v139_v51 }
  0x44   :  { %v88_v14 = vmul.f32 %v87_v1, %v84_v0  ;;  %v92_v16 = vmul.f32 %v91_v2, %v84_v0  ;;  %v126_v20 = vsub.f32 2.0, %v125_v15 }
  0x45   :  { %v109_v17 = vmul.f32 %v108_v4, %v105_v10  ;;  %v112_v18 = vmul.f32 %v111_v5, %v105_v10  ;;  %v142_v23 = vsub.f32 2.0, %v141_v19 }
  0x46   :  { %v127_v29 = vmul.f32 %v242_v9, %v126_v20 }
  0x47   :  { %v113_v26 = vadd.f32 %v109_v17, %v88_v14  ;;  %v114_v28 = vadd.f32 %v112_v18, %v92_v16  ;;  %v143_v30 = vmul.f32 %v244_v13, %v142_v23 }
  0x48   :  { %v130_v31 = vmul.f32 %v129_v21, %v127_v29  ;;  %v134_v27 = vmul.f32 %v133_v22, %v127_v29 }
  0x49   :  { %v146_v32 = vmul.f32 %v145_v24, %v143_v30  ;;  %v149_v33 = vmul.f32 %v148_v25, %v143_v30 }
  0x4a   :  { %v135_v34 = vadd.f32 %v130_v31, %v113_v26  ;;  %v136_v35 = vadd.f32 %v134_v27, %v114_v28 }
  0x4c   :  { %v150_v38 = vadd.f32 %v146_v32, %v135_v34  ;;  %v151_v39 = vadd.f32 %v149_v33, %v136_v35 }
  0x4e   :  { %v152_v40 = vmul.f32 %v150_v38, %v63_v36  ;;  %v153_v41 = vmul.f32 %v151_v39, %v65_v37 }
  0x50   :  { %v154_v42 = vmul.f32 %v152_v40, %v152_v40  ;;  %v155_v43 = vmul.f32 %v153_v41, %v153_v41  ;;  %v158_v44 = vmul.f32 %v153_v41, %v152_v40 }
  0x52   :  { %v156_v45 = vadd.f32 %v155_v43, %v154_v42  ;;  %v159_v46 = vmul.f32 1868.1318, %v158_v44 }
  0x54   :  { %v157_v47 = vmul.f32 1318.6813, %v156_v45 }
  0x56   :  { %v160_v48 = vadd.f32 %v159_v46, %v157_v47 }
  0x58   :  { %v161_v49 = vmul.f32 %v160_v48, %v160_v48 }
  0x5a   :  { %197 = vadd.xlane.f32.xlu0 %v161_v49 }
  0xc1   :  { %v185_v50 = vpop.xlane.xlu0 %184 }
  0xc2   :  { %v186_v51 = vrot.slane %v185_v50, 4 }
  0xc4   :  { %v187_v52 = vadd.f32 %v186_v51, %v185_v50 }
  0xc6   :  { %v188_v53 = vrot.slane %v187_v52, 2 }
  0xc8   :  { %v189_v54 = vadd.f32 %v188_v53, %v187_v52 }
  0xca   :  { %v190_v55 = vrot.slane %v189_v54, 1 }
  0xcc   :  { %v191_v56 = vadd.f32 %v190_v55, %v189_v54 }
  0xce   :  { %228 = vpush %v191_v56 }
  0xe7   :  { %v198_v57 = vpop.xlane.xlu0 %197 }
  0xe8   :  { %v199_v58 = vrot.slane %v198_v57, 4 }
  0xea   :  { %v200_v59 = vadd.f32 %v199_v58, %v198_v57 }
  0xec   :  { %v201_v60 = vrot.slane %v200_v59, 2 }
  0xee   :  { %v202_v61 = vadd.f32 %v201_v60, %v200_v59 }
  0xf0   :  { %v203_v62 = vrot.slane %v202_v61, 1 }
  0xf2   :  { %v204_v63 = vadd.f32 %v203_v62, %v202_v61 }
  0xf4   :  { %230 = vpush %v204_v63 }
  0xff   :  { %s229_s1 = spop %228 }
 0x100   :  { %s207_s6 = smul.f32 1e+10, %s229_s1 }
 0x125   :  { %s231_s9 = spop %230 }
 0x126   :  { %s208_s10 = sadd.f32 %s231_s9, %s207_s6 }
 0x128   :  { %v209_v0 = vstv %s208_s10 }
 0x129   :  { %211 = vst [vmem:[#allocation8] sm:$0xff] %v209_v0 }
 0x12a   :  { %300 = shalt.err (!%p297_p6)
}
 0x12b   :  { %s301_s14 = scalar_lea.hbm %s375_s2, 128 }
 0x12c   :  { %p302_p7 = scmp.ne.s32.totalorder %s375_s2, %s301_s14  ;;  %p305_p8 = scmp.lt.u32.totalorder %s301_s14, %s375_s2 }
 0x12e   :  { %p307_p9 = pnand %p305_p8, %p302_p7 }
 0x130   :  { %310 = shalt.err (!%p307_p9)
}
 0x131   :  { %221 = dma.vmem_to_hbm [thread:$0]  %s219_s8, 128, %s375_s2, [#allocation5]  }
 0x132   :  { %315 = dma.done.wait [#allocation5], 128  }
 0x133   :  { %316 = vsyncadd [#allocation5], 4294967168 }
 0x134   :  { %225 = vsyncpa [#allocation4], 1 }
 0x135   :  { %226 = vsyncpa [#allocation7], 1 }
 0x136   :  { %227 = vsyncpa [#allocation5], 1 }

</bundles_post_ra>
